<compile_context>
chip_gen: v5e
topology: v5e:2x2
jax: 0.10.0
libtpu: 0.0.40
codegen_flags: <defaults>
</compile_context>

<pallas_src>
import re
from functools import lru_cache

import numpy as np
import jax
import jax.numpy as jnp
from jax.experimental import pallas as pl
from jax.experimental.pallas import tpu as pltpu

LANE = 128          # lane width (last dim of the character grid)
BLOCK_ROWS = 32     # rows per grid step: int8 sublane tile (32) & int16 tile (16) aligned

# Constant 128x128 inclusive upper-triangular scan matrix, T[j, i] = (j <= i),
# so row_prefix_sum(v) = v @ T.  bf16 is exact for 0/1 values; f32 accumulation
# in the kernel keeps the depths exact.
_TRI = jnp.asarray(
    (np.arange(LANE)[:, None] <= np.arange(LANE)[None, :]).astype(np.float32),
    dtype=jnp.bfloat16)


def _normalize_kernel(codes_ref, tri_ref, out_ref, carry_ref):
    """Lowercase ASCII codes and flag chars inside [...] / {...} spans.

    Layout: (BLOCK_ROWS, 128) row-major character grid per grid step.
    Output: packed int16 per char: low byte = lowered code, bit 8 = keep flag.
    carry_ref: (1, 2) f32 running bracket depth entering this block
               (col 0 = '[' spans, col 1 = '{' spans).
    """
    @pl.when(pl.program_id(0) == 0)
    def _init():
        carry_ref[...] = jnp.zeros_like(carry_ref)

    c = codes_ref[...].astype(jnp.int32)                 # (BR, 128) int32, 0 = pad
    br = c.shape[0]

    # ---- txt.lower(): pure VPU elementwise ---------------------------------
    lc = jnp.where((c >= 65) & (c <= 90), c + 32, c)

    # ---- signed bracket deltas per span type (f32; one bf16 cast at the MXU)
    d_sq = (lc == 91).astype(jnp.float32) - (lc == 93).astype(jnp.float32)
    d_br = (lc == 123).astype(jnp.float32) - (lc == 125).astype(jnp.float32)
    deltas = jnp.concatenate([d_sq, d_br], axis=0).astype(jnp.bfloat16)   # (2BR, 128)

    # ---- intra-row inclusive prefix sums: one tile-aligned bf16 MXU pass ----
    intra = jnp.dot(deltas, tri_ref[...],
                    preferred_element_type=jnp.float32)                  # (2BR, 128) f32
    intra_sq, intra_br = intra[:br], intra[br:]

    # ---- exclusive per-row offsets: reduce-then-scan (tiny O(BR^2)) ---------
    # The inclusive prefix's last lane is the per-row total; a (BR, BR)
    # strict-lower-tri matmul over those totals gives the exclusive offsets.
    tot2 = jnp.concatenate([intra_sq[:, LANE - 1:], intra_br[:, LANE - 1:]],
                           axis=1)                                        # (BR, 2)
    dst = jax.lax.broadcasted_iota(jnp.int32, (br, br), 0)
    src = jax.lax.broadcasted_iota(jnp.int32, (br, br), 1)
    strict_lower = (src < dst).astype(jnp.float32)
    off2 = jnp.dot(strict_lower, tot2,
                   preferred_element_type=jnp.float32)                   # (BR, 2)

    carry = carry_ref[...]                                               # (1, 2) f32

    # depth counts the current opener (inclusive scan) and adds the current
    # closer back, so '[', interior chars and ']' are all flagged.
    depth_sq = intra_sq + off2[:, 0:1] + carry[0:1, 0:1] + (lc == 93).astype(jnp.float32)
    depth_br = intra_br + off2[:, 1:2] + carry[0:1, 1:2] + (lc == 125).astype(jnp.float32)

    inside = (depth_sq > 0.5) | (depth_br > 0.5)
    keep = (~(inside | (c == 0))).astype(jnp.int32)

    # ---- fused packed output: halves writeback + D2H traffic ---------------
    out_ref[...] = (lc | (keep << 8)).astype(jnp.int16)

    # ---- carry the running depths into the next row-block ------------------
    carry_ref[...] = carry + off2[br - 1:br, :] + tot2[br - 1:br, :]


@lru_cache(maxsize=None)
def _normalizer_call(num_blocks: int):
    rows = num_blocks * BLOCK_ROWS
    call = pl.pallas_call(
        _normalize_kernel,
        out_shape=jax.ShapeDtypeStruct((rows, LANE), jnp.int16),
        grid_spec=pltpu.PrefetchScalarGridSpec(
            num_scalar_prefetch=0,
            grid=(num_blocks,),
            in_specs=[pl.BlockSpec((BLOCK_ROWS, LANE), lambda i: (i, 0)),
                      pl.BlockSpec((LANE, LANE), lambda i: (0, 0))],   # tri: resident
            out_specs=pl.BlockSpec((BLOCK_ROWS, LANE), lambda i: (i, 0)),
            scratch_shapes=[pltpu.VMEM((1, 2), jnp.float32)]),
        compiler_params=pltpu.CompilerParams(
            dimension_semantics=("arbitrary",)),   # sequential: depth carry
    )
    return jax.jit(call)


def pallas_lower_and_mask(codes):
    """codes: (R, 128) int8, R % BLOCK_ROWS == 0.  Returns packed int16 (R, 128)."""
    return _normalizer_call(codes.shape[0] // BLOCK_ROWS)(codes, _TRI)


class EasyComTextNormalizerPallas:
    """JAX/Pallas re-implementation of EasyComTextNormalizer.forward."""

    def __init__(self):
        # NOTE: keys with uppercase letters (' Kay.', '-Kay.') never match after
        # lowercasing — identical behaviour to the PyTorch reference, kept as-is.
        self.replacements = {
            'dunno': 'do not know', 'okay': 'ok', 'aw ': '0 ', 'yep': 'yeah',
            '-eah': 'yeah', 'plenty full': 'plentyfull', 'nope': 'no',
            ' ah. ': ' ', 'oh. ': ' ', 'alright': 'all right', 'nah': 'no',
            'woah': 'whoa', ' Kay.': ' ok', '-Kay.': 'ok', ' bout ': ' about ',
            '-owntown': 'downtown', "y'know": 'you know', 'one': '1',
            'two': '2', 'three': '3', 'four': '4', 'five': '5', 'six': '6',
            'seven': '7', 'eight': '8', 'nine': '9', 'ten': '10',
        }

    def __call__(self, txt: str) -> str:
        # ---- encode + pad to a lane-dense (R, 128) int8 grid (glue) --------
        raw = np.frombuffer(txt.encode('ascii', errors='replace'),
                            dtype=np.uint8).astype(np.int8)       # ASCII <= 127
        n = max(int(raw.shape[0]), 1)
        rows_needed = -(-n // LANE)
        blocks_needed = -(-rows_needed // BLOCK_ROWS)
        num_blocks = 1 << int(np.ceil(np.log2(blocks_needed)))    # bucket: bounded recompiles
        rows = num_blocks * BLOCK_ROWS
        codes = np.zeros((rows, LANE), dtype=np.int8)
        codes.reshape(-1)[:raw.shape[0]] = raw

        # ---- Pallas hot path: lowercase + bracket/brace span masking -------
        packed = pallas_lower_and_mask(jnp.asarray(codes))
        packed = np.asarray(jax.block_until_ready(packed)).reshape(-1)   # one D2H

        lc = (packed & 0x7F).astype(np.uint8)
        keep = ((packed >> 8) & 1).astype(bool)
        out = lc[keep].tobytes().decode('ascii', errors='replace').strip()

        # TODO(synk): depth-based span masking matches re.sub('\[.*?\]', ...) for
        # balanced, non-nested spans; unbalanced/nested brackets diverge.
        # ---- host-side variable-length string edits (no fixed-shape Pallas
        #      equivalent: substring replace / regex change string length) ---
        for k, v in self.replacements.items():
            out = out.replace(k, v)
        out = re.sub(r"[\w\']*-", '', out).replace('  ', ' ').strip()

        # TODO(synk): Whisper's EnglishTextNormalizer (large regex/dictionary
        # pipeline) has no Pallas equivalent; minimal stand-in applied here.
        out = re.sub(r"[^\w\s']", '', out)
        out = re.sub(r'\s+', ' ', out).strip()
        return out


if __name__ == "__main__":
    # Deterministic synthetic input: fixed phrase + random letters/spaces
    # sampled with PRNGKey(0).
    key = jax.random.PRNGKey(0)
    alphabet = np.array(list("abcdefghijklmnopqrstuvwxyz      "))
    idx = np.asarray(jax.random.randint(key, (48,), 0, len(alphabet)))
    rand_tail = "".join(alphabet[idx])

    txt = ("Okay [NOISE] I dunno, it was ALRIGHT {laugh} one-two three "
           + rand_tail)

    normalizer = EasyComTextNormalizerPallas()
    result = normalizer(txt)
    assert isinstance(result, str) and len(result) > 0
    print("KERNEL_OK")
</pallas_src>

<mosaic_0001>
module attributes {stable_mosaic.version = 11 : i64} {
  func.func @_normalize_kernel(%arg0: i32, %arg1: memref<32x128xi8, #tpu.memory_space<vmem>>, %arg2: memref<128x128xbf16, #tpu.memory_space<vmem>>, %arg3: memref<32x128xi16, #tpu.memory_space<vmem>>, %arg4: memref<1x2xf32, #tpu.memory_space<vmem>>) attributes {dimension_semantics = [#tpu.dimension_semantics<arbitrary>], iteration_bounds = array<i64: 1>, scalar_prefetch = 0 : i64, scratch_operands = 1 : i64, tpu.core_type = #tpu.core_type<tc>, window_params = [{transform_indices = @transform_0, window_bounds = array<i64: 32, 128>}, {pipeline_mode = #tpu.pipeline_mode<synchronous>, transform_indices = @transform_1, window_bounds = array<i64: 128, 128>}, {transform_indices = @transform_2, window_bounds = array<i64: 32, 128>}]} {
    %c0_i32 = arith.constant 0 : i32
    %0 = arith.cmpi eq, %arg0, %c0_i32 : i32
    %1 = arith.extui %0 : i1 to i32
    %c0_i32_0 = arith.constant 0 : i32
    %2 = arith.cmpi ne, %1, %c0_i32_0 : i32
    scf.if %2 {
      %cst_17 = arith.constant 0.000000e+00 : f32
      %89 = vector.broadcast %cst_17 : f32 to vector<1x2xf32>
      %c0_18 = arith.constant 0 : index
      %c0_19 = arith.constant 0 : index
      %90 = vector.load %arg4[%c0_18, %c0_19] : memref<1x2xf32, #tpu.memory_space<vmem>>, vector<1x2xf32>
      tpu.vector_store %arg4[%c0_18, %c0_19], %89 {strides = array<i32>} : memref<1x2xf32, #tpu.memory_space<vmem>>, vector<1x2xf32>,
    } else {
    }
    %c0 = arith.constant 0 : index
    %c0_1 = arith.constant 0 : index
    %3 = vector.load %arg1[%c0, %c0_1] : memref<32x128xi8, #tpu.memory_space<vmem>>, vector<32x128xi8>
    %4 = arith.extsi %3 : vector<32x128xi8> to vector<32x128xi32>
    %c65_i32 = arith.constant 65 : i32
    %5 = vector.broadcast %c65_i32 : i32 to vector<32x128xi32>
    %6 = arith.cmpi sge, %4, %5 : vector<32x128xi32>
    %c90_i32 = arith.constant 90 : i32
    %7 = vector.broadcast %c90_i32 : i32 to vector<32x128xi32>
    %8 = arith.cmpi sle, %4, %7 : vector<32x128xi32>
    %9 = arith.andi %6, %8 : vector<32x128xi1>
    %c32_i32 = arith.constant 32 : i32
    %10 = vector.broadcast %c32_i32 : i32 to vector<32x128xi32>
    %11 = arith.addi %4, %10 : vector<32x128xi32>
    %12 = arith.select %9, %11, %4 : vector<32x128xi1>, vector<32x128xi32>
    %c91_i32 = arith.constant 91 : i32
    %13 = vector.broadcast %c91_i32 : i32 to vector<32x128xi32>
    %14 = arith.cmpi eq, %12, %13 : vector<32x128xi32>
    %15 = arith.extui %14 : vector<32x128xi1> to vector<32x128xi32>
    %16 = arith.sitofp %15 : vector<32x128xi32> to vector<32x128xf32>
    %c93_i32 = arith.constant 93 : i32
    %17 = vector.broadcast %c93_i32 : i32 to vector<32x128xi32>
    %18 = arith.cmpi eq, %12, %17 : vector<32x128xi32>
    %19 = arith.extui %18 : vector<32x128xi1> to vector<32x128xi32>
    %20 = arith.sitofp %19 : vector<32x128xi32> to vector<32x128xf32>
    %21 = arith.subf %16, %20 : vector<32x128xf32>
    %c123_i32 = arith.constant 123 : i32
    %22 = vector.broadcast %c123_i32 : i32 to vector<32x128xi32>
    %23 = arith.cmpi eq, %12, %22 : vector<32x128xi32>
    %24 = arith.extui %23 : vector<32x128xi1> to vector<32x128xi32>
    %25 = arith.sitofp %24 : vector<32x128xi32> to vector<32x128xf32>
    %c125_i32 = arith.constant 125 : i32
    %26 = vector.broadcast %c125_i32 : i32 to vector<32x128xi32>
    %27 = arith.cmpi eq, %12, %26 : vector<32x128xi32>
    %28 = arith.extui %27 : vector<32x128xi1> to vector<32x128xi32>
    %29 = arith.sitofp %28 : vector<32x128xi32> to vector<32x128xf32>
    %30 = arith.subf %25, %29 : vector<32x128xf32>
    %31 = tpu.concatenate %21, %30 in 0 : vector<32x128xf32>, vector<32x128xf32> -> vector<64x128xf32>
    %32 = arith.truncf %31 : vector<64x128xf32> to vector<64x128xbf16>
    %c0_2 = arith.constant 0 : index
    %c0_3 = arith.constant 0 : index
    %33 = vector.load %arg2[%c0_2, %c0_3] : memref<128x128xbf16, #tpu.memory_space<vmem>>, vector<128x128xbf16>
    %cst = arith.constant dense<0.000000e+00> : vector<64x128xf32>
    %34 = tpu.matmul %32, %33, %cst {dimension_numbers = #tpu.dot_dimension_numbers<[1], [0], [0], [1], [0, 0, 1, 1], [], []>} : vector<64x128xbf16>, vector<128x128xbf16>, vector<64x128xf32> -> vector<64x128xf32>
    %35 = vector.extract_strided_slice %34 {offsets = [0, 0], sizes = [32, 128], strides = [1, 1]} : vector<64x128xf32> to vector<32x128xf32>
    %36 = vector.extract_strided_slice %34 {offsets = [32, 0], sizes = [32, 128], strides = [1, 1]} : vector<64x128xf32> to vector<32x128xf32>
    %37 = vector.extract_strided_slice %35 {offsets = [0, 127], sizes = [32, 1], strides = [1, 1]} : vector<32x128xf32> to vector<32x1xf32>
    %38 = vector.extract_strided_slice %36 {offsets = [0, 127], sizes = [32, 1], strides = [1, 1]} : vector<32x128xf32> to vector<32x1xf32>
    %39 = tpu.concatenate %37, %38 in 1 : vector<32x1xf32>, vector<32x1xf32> -> vector<32x2xf32>
    %40 = tpu.iota {dimensions = array<i32: 0>} : vector<32x32xi32>
    %41 = tpu.iota {dimensions = array<i32: 1>} : vector<32x32xi32>
    %42 = arith.cmpi slt, %41, %40 : vector<32x32xi32>
    %43 = arith.extui %42 : vector<32x32xi1> to vector<32x32xi32>
    %44 = arith.sitofp %43 : vector<32x32xi32> to vector<32x32xf32>
    %cst_4 = arith.constant dense<0.000000e+00> : vector<32x2xf32>
    %45 = tpu.matmul %44, %39, %cst_4 {dimension_numbers = #tpu.dot_dimension_numbers<[1], [0], [0], [1], [0, 0, 1, 1], [], []>} : vector<32x32xf32>, vector<32x2xf32>, vector<32x2xf32> -> vector<32x2xf32>
    %c0_5 = arith.constant 0 : index
    %c0_6 = arith.constant 0 : index
    %46 = vector.load %arg4[%c0_5, %c0_6] : memref<1x2xf32, #tpu.memory_space<vmem>>, vector<1x2xf32>
    %47 = vector.extract_strided_slice %45 {offsets = [0, 0], sizes = [32, 1], strides = [1, 1]} : vector<32x2xf32> to vector<32x1xf32>
    %48 = vector.broadcast %47 : vector<32x1xf32> to vector<32x128xf32>
    %49 = arith.addf %35, %48 : vector<32x128xf32>
    %50 = vector.extract_strided_slice %46 {offsets = [0, 0], sizes = [1, 1], strides = [1, 1]} : vector<1x2xf32> to vector<1x1xf32>
    %51 = vector.broadcast %50 : vector<1x1xf32> to vector<32x128xf32>
    %52 = arith.addf %49, %51 : vector<32x128xf32>
    %c93_i32_7 = arith.constant 93 : i32
    %53 = vector.broadcast %c93_i32_7 : i32 to vector<32x128xi32>
    %54 = arith.cmpi eq, %12, %53 : vector<32x128xi32>
    %55 = arith.extui %54 : vector<32x128xi1> to vector<32x128xi32>
    %56 = arith.sitofp %55 : vector<32x128xi32> to vector<32x128xf32>
    %57 = arith.addf %52, %56 : vector<32x128xf32>
    %58 = vector.extract_strided_slice %45 {offsets = [0, 1], sizes = [32, 1], strides = [1, 1]} : vector<32x2xf32> to vector<32x1xf32>
    %59 = vector.broadcast %58 : vector<32x1xf32> to vector<32x128xf32>
    %60 = arith.addf %36, %59 : vector<32x128xf32>
    %61 = vector.extract_strided_slice %46 {offsets = [0, 1], sizes = [1, 1], strides = [1, 1]} : vector<1x2xf32> to vector<1x1xf32>
    %62 = vector.broadcast %61 : vector<1x1xf32> to vector<32x128xf32>
    %63 = arith.addf %60, %62 : vector<32x128xf32>
    %c125_i32_8 = arith.constant 125 : i32
    %64 = vector.broadcast %c125_i32_8 : i32 to vector<32x128xi32>
    %65 = arith.cmpi eq, %12, %64 : vector<32x128xi32>
    %66 = arith.extui %65 : vector<32x128xi1> to vector<32x128xi32>
    %67 = arith.sitofp %66 : vector<32x128xi32> to vector<32x128xf32>
    %68 = arith.addf %63, %67 : vector<32x128xf32>
    %cst_9 = arith.constant 5.000000e-01 : f32
    %69 = vector.broadcast %cst_9 : f32 to vector<32x128xf32>
    %70 = arith.cmpf ogt, %57, %69 : vector<32x128xf32>
    %cst_10 = arith.constant 5.000000e-01 : f32
    %71 = vector.broadcast %cst_10 : f32 to vector<32x128xf32>
    %72 = arith.cmpf ogt, %68, %71 : vector<32x128xf32>
    %73 = arith.ori %70, %72 : vector<32x128xi1>
    %c0_i32_11 = arith.constant 0 : i32
    %74 = vector.broadcast %c0_i32_11 : i32 to vector<32x128xi32>
    %75 = arith.cmpi eq, %4, %74 : vector<32x128xi32>
    %76 = arith.ori %73, %75 : vector<32x128xi1>
    %cst_12 = arith.constant dense<true> : vector<32x128xi1>
    %77 = arith.xori %76, %cst_12 : vector<32x128xi1>
    %78 = arith.extui %77 : vector<32x128xi1> to vector<32x128xi32>
    %c8_i32 = arith.constant 8 : i32
    %79 = vector.broadcast %c8_i32 : i32 to vector<32x128xi32>
    %80 = arith.shli %78, %79 : vector<32x128xi32>
    %81 = arith.ori %12, %80 : vector<32x128xi32>
    %82 = arith.trunci %81 : vector<32x128xi32> to vector<32x128xi16>
    %c0_13 = arith.constant 0 : index
    %c0_14 = arith.constant 0 : index
    %83 = vector.load %arg3[%c0_13, %c0_14] : memref<32x128xi16, #tpu.memory_space<vmem>>, vector<32x128xi16>
    tpu.vector_store %arg3[%c0_13, %c0_14], %82 {strides = array<i32>} : memref<32x128xi16, #tpu.memory_space<vmem>>, vector<32x128xi16>,
    %84 = vector.extract_strided_slice %45 {offsets = [31, 0], sizes = [1, 2], strides = [1, 1]} : vector<32x2xf32> to vector<1x2xf32>
    %85 = arith.addf %46, %84 : vector<1x2xf32>
    %86 = vector.extract_strided_slice %39 {offsets = [31, 0], sizes = [1, 2], strides = [1, 1]} : vector<32x2xf32> to vector<1x2xf32>
    %87 = arith.addf %85, %86 : vector<1x2xf32>
    %c0_15 = arith.constant 0 : index
    %c0_16 = arith.constant 0 : index
    %88 = vector.load %arg4[%c0_15, %c0_16] : memref<1x2xf32, #tpu.memory_space<vmem>>, vector<1x2xf32>
    tpu.vector_store %arg4[%c0_15, %c0_16], %87 {strides = array<i32>} : memref<1x2xf32, #tpu.memory_space<vmem>>, vector<1x2xf32>,
    return
  }
  func.func @transform_0(%arg0: i32) -> (i32, i32) {
    %c0_i32 = arith.constant 0 : i32
    %c0_i32_0 = arith.constant 0 : i32
    return %arg0, %c0_i32 : i32, i32
  }
  func.func @transform_1(%arg0: i32) -> (i32, i32) {
    %c0_i32 = arith.constant 0 : i32
    %c0_i32_0 = arith.constant 0 : i32
    %c0_i32_1 = arith.constant 0 : i32
    return %c0_i32, %c0_i32_0 : i32, i32
  }
  func.func @transform_2(%arg0: i32) -> (i32, i32) {
    %c0_i32 = arith.constant 0 : i32
    %c0_i32_0 = arith.constant 0 : i32
    return %arg0, %c0_i32 : i32, i32
  }
}

</mosaic_0001>

<bundles_post_ra>
// kernel: tpu_custom_call.1
= control target key start
LH: loop header
LB: loop body
LE: loop exit
PB: predicated region body
PF: predicated region fallthrough
CT: control target
= control target key end

     0   :  { %7 = vsyncpa [#allocation4], 0  ;;  %s872_s0 = inlined_call_operand.hbm [shape: s8[32,128], index: 0, kind: input, shape index: {}]   ;;  %s873_s1 = inlined_call_operand.hbm [shape: bf16[128,128], index: 1, kind: input, shape index: {}]   ;;  %s874_s2 = inlined_call_operand.hbm [shape: s16[32,128], index: 2, kind: output, shape index: {}]  }
   0x1   :  { %8 = vsyncpa [#allocation7], 0 }
   0x2   :  { %9 = vsyncpa [#allocation5], 0  ;;  %s15_s11 = sshll.u32 %s872_s0, 4  ;;  %s660_s12 = smov [#allocation3]   ;;  %s16_s11 = int_to_ptr.hbm [resolvable:$true] %s15_s11 }
   0x3   :  { %s17_s13 = sshll.u32 %s660_s12, 4  ;;  %s25_s16 = sshll.u32 %s873_s1, 4  ;;  %s18_s13 = int_to_ptr.vmem [resolvable:$true] %s17_s13  ;;  %s26_s16 = int_to_ptr.hbm [resolvable:$true] %s25_s16 }
   0x4   :  { %20 = dma.hbm_to_vmem [thread:$0]  %s16_s11, 128, %s18_s13, [#allocation4]  }
   0x5   :  { %s661_s17 = smov [#allocation6]   ;;  %s662_s19 = smov 64  }
   0x6   :  { %s27_s18 = sshll.u32 %s661_s17, 4  ;;  %s663_s20 = smov 4   ;;  %s28_s18 = int_to_ptr.vmem [resolvable:$true] %s27_s18 }
   0x7   :  { %33 = dma.hbm_to_vmem [thread:$0]  %s26_s16, 1024, %s28_s18, [#allocation7], %s662_s19, %s662_s19, %s663_s20  }
   0x8   :  { %654 = dma.done.wait [#allocation4], 128  }
   0x9   :  { %655 = vsyncadd [#allocation4], 4294967168 }
   0xa   :  { %656 = dma.done.wait [#allocation7], 1024  }
   0xb   :  { %657 = vsyncadd [#allocation7], 4294966272  ;;  %v535_v0 = vld [vmem:[#allocation6 + $0x38] sm:$0xff]  ;;  %v534_v1 = vld [vmem:[#allocation6 + $0x30] sm:$0xff]  ;;  %v664_v19 = vmov 0.0   ;;  %s665_s0 = smov 1   ;;  %v263_v63 = vlaneseq }
   0xc   :  { %197 = vmatpush.bf16.msra.mxu0 %v535_v0  ;;  %536 = vmatpush.bf16.msra.mxu2 %v535_v0  ;;  %v48_v2 = vld [vmem:[#allocation3] sm:$0xff]  ;;  %v533_v6 = vld [vmem:[#allocation6 + $0x28] sm:$0xff]  ;;  %v532_v8 = vld [vmem:[#allocation6 + $0x20] sm:$0xff]  ;;  %s666_s1 = smov 2   ;;  %s670_s21 = smov [#allocation8]  }
   0xd   :  { %537 = vmatpush.bf16.msra.mxu3 %v535_v0  ;;  %v695_v3 = vunpack.c.0.s8 %v48_v2  ;;  %v697_v4 = vunpack.c.1.s8 %v48_v2  ;;  %v699_v5 = vunpack.c.2.s8 %v48_v2  ;;  %v701_v7 = vunpack.c.3.s8 %v48_v2  ;;  %v531_v13 = vld [vmem:[#allocation6 + $0x18] sm:$0xff]  ;;  %v530_v18 = vld [vmem:[#allocation6 + $0x10] sm:$0xff]  ;;  %v529_v24 = vld [vmem:[#allocation6 + $0x8] sm:$0xff]  ;;  %s456_s22 = sshll.u32 %s670_s21, 4  ;;  %s458_s25 = sshll.u32 %s874_s2, 4  ;;  %s457_s22 = int_to_ptr.vmem [resolvable:$true] %s456_s22  ;;  %s459_s25 = int_to_ptr.hbm [resolvable:$true] %s458_s25 }
   0xe   :  { %v528_v37 = vld [vmem:[#allocation6] sm:$0xff]  ;;  %v264_v2 = vshrl.u32 %v263_v63, 7 }
   0xf   :  { %vm53_vm0 = vcmp.ge.s32.totalorder %v695_v3, 65  ;;  %vm57_vm1 = vcmp.le.s32.totalorder %v695_v3, 90  ;;  %vm54_vm2 = vcmp.ge.s32.totalorder %v697_v4, 65  ;;  %vm58_vm3 = vcmp.le.s32.totalorder %v697_v4, 90 }
  0x10   :  { %198 = vmatpush.bf16.msra.mxu0 %v534_v1  ;;  %538 = vmatpush.bf16.msra.mxu2 %v534_v1  ;;  %vm55_vm4 = vcmp.ge.s32.totalorder %v699_v5, 65  ;;  %vm59_vm5 = vcmp.le.s32.totalorder %v699_v5, 90  ;;  %vm61_vm6 = vmand %vm53_vm0, %vm57_vm1  ;;  %vm56_vm7 = vcmp.ge.s32.totalorder %v701_v7, 65  ;;  %vm60_vm8 = vcmp.le.s32.totalorder %v701_v7, 90 }
  0x11   :  { %539 = vmatpush.bf16.msra.mxu3 %v534_v1  ;;  %vm62_vm9 = vmand %vm54_vm2, %vm58_vm3  ;;  %v65_v9 = vadd.s32 32, %v695_v3  ;;  %v66_v10 = vadd.s32 32, %v697_v4  ;;  %v67_v11 = vadd.s32 32, %v699_v5  ;;  %v68_v12 = vadd.s32 32, %v701_v7 }
  0x12   :  { %vm63_vm10 = vmand %vm55_vm4, %vm59_vm5 }
  0x13   :  { %vm64_vm11 = vmand %vm56_vm7, %vm60_vm8  ;;  %v716_v14 = vsel %vm61_vm6, %v65_v9, %v695_v3  ;;  %v719_v15 = vsel %vm62_vm9, %v66_v10, %v697_v4  ;;  %v722_v16 = vsel %vm63_vm10, %v67_v11, %v699_v5 }
  0x14   :  { %199 = vmatpush.bf16.msra.mxu0 %v533_v6  ;;  %540 = vmatpush.bf16.msra.mxu2 %v533_v6  ;;  %v725_v17 = vsel %vm64_vm11, %v68_v12, %v701_v7  ;;  %vm73_vm12 = vcmp.eq.s32.totalorder %v716_v14, 91  ;;  %vm74_vm13 = vcmp.eq.s32.totalorder %v719_v15, 91  ;;  %vm85_vm14 = vcmp.eq.s32.totalorder %v716_v14, 93 }
  0x15   :  { %541 = vmatpush.bf16.msra.mxu3 %v533_v6  ;;  %vm86_vm15 = vcmp.eq.s32.totalorder %v719_v15, 93  ;;  %vm75_vm0 = vcmp.eq.s32.totalorder %v722_v16, 91  ;;  %vm76_vm1 = vcmp.eq.s32.totalorder %v725_v17, 91  ;;  %vm87_vm2 = vcmp.eq.s32.totalorder %v722_v16, 93 }
  0x16   :  { %vm88_vm3 = vcmp.eq.s32.totalorder %v725_v17, 93  ;;  %vm101_vm4 = vcmp.eq.s32.totalorder %v716_v14, 123  ;;  %vm102_vm5 = vcmp.eq.s32.totalorder %v719_v15, 123  ;;  %vm113_vm6 = vcmp.eq.s32.totalorder %v716_v14, 125 }
  0x17   :  { %vm114_vm7 = vcmp.eq.s32.totalorder %v719_v15, 125  ;;  %v472_v20 = vsel %vm73_vm12, 1.0, %v664_v19  ;;  %v473_v21 = vsel %vm74_vm13, 1.0, %v664_v19  ;;  %v742_v22 = vsel %vm85_vm14, 1.0, %v664_v19 }
  0x18   :  { %200 = vmatpush.bf16.msra.mxu0 %v532_v8  ;;  %542 = vmatpush.bf16.msra.mxu2 %v532_v8  ;;  %v745_v23 = vsel %vm86_vm15, 1.0, %v664_v19  ;;  %v474_v25 = vsel %vm75_vm0, 1.0, %v664_v19  ;;  %v475_v26 = vsel %vm76_vm1, 1.0, %v664_v19  ;;  %v756_v27 = vsel %vm87_vm2, 1.0, %v664_v19 }
  0x19   :  { %543 = vmatpush.bf16.msra.mxu3 %v532_v8  ;;  %v761_v28 = vsel %vm88_vm3, 1.0, %v664_v19  ;;  %v480_v29 = vsel %vm101_vm4, 1.0, %v664_v19  ;;  %v481_v30 = vsel %vm102_vm5, 1.0, %v664_v19  ;;  %v772_v31 = vsel %vm113_vm6, 1.0, %v664_v19 }
  0x1a   :  { %v777_v32 = vsel %vm114_vm7, 1.0, %v664_v19  ;;  %v97_v33 = vsub.f32 %v472_v20, %v742_v22  ;;  %v98_v34 = vsub.f32 %v473_v21, %v745_v23  ;;  %v99_v35 = vsub.f32 %v474_v25, %v756_v27 }
  0x1b   :  { %v100_v36 = vsub.f32 %v475_v26, %v761_v28  ;;  %v125_v38 = vsub.f32 %v480_v29, %v772_v31  ;;  %v126_v39 = vsub.f32 %v481_v30, %v777_v32  ;;  %vm103_vm8 = vcmp.eq.s32.totalorder %v722_v16, 123 }
  0x1c   :  { %201 = vmatpush.bf16.msra.mxu0 %v531_v13  ;;  %544 = vmatpush.bf16.msra.mxu2 %v531_v13  ;;  %v129_v40 = vpack.c.bf16 %v98_v34, %v97_v33  ;;  %vm104_vm9 = vcmp.eq.s32.totalorder %v725_v17, 123  ;;  %vm115_vm10 = vcmp.eq.s32.totalorder %v722_v16, 125  ;;  %vm116_vm11 = vcmp.eq.s32.totalorder %v725_v17, 125 }
  0x1d   :  { %545 = vmatpush.bf16.msra.mxu3 %v531_v13  ;;  %v130_v41 = vpack.c.bf16 %v100_v36, %v99_v35  ;;  %v131_v42 = vpack.c.bf16 %v126_v39, %v125_v38  ;;  %v482_v43 = vsel %vm103_vm8, 1.0, %v664_v19  ;;  %v483_v44 = vsel %vm104_vm9, 1.0, %v664_v19 }
  0x1e   :  { %v792_v45 = vsel %vm115_vm10, 1.0, %v664_v19  ;;  %v795_v46 = vsel %vm116_vm11, 1.0, %v664_v19  ;;  %v269_v6 = vand.u32 127, %v263_v63  ;;  %vm258_vm12 = vcmask 7168  }
  0x1f   :  { %v127_v47 = vsub.f32 %v482_v43, %v792_v45  ;;  %v128_v48 = vsub.f32 %v483_v44, %v795_v46  ;;  %v667_v12 = vmov 1   ;;  %v668_v20 = vmov 0  }
  0x20   :  { %202 = vmatpush.bf16.msra.mxu0 %v530_v18  ;;  %546 = vmatpush.bf16.msra.mxu2 %v530_v18  ;;  %vm270_vm13 = vcmp.lt.s32.totalorder %v269_v6, %v264_v2  ;;  %vm282_vm14 = vcmask 261120   ;;  %v265_v29 = vadd.s32 8, %v264_v2  ;;  %v266_v33 = vadd.s32 16, %v264_v2 }
  0x21   :  { %547 = vmatpush.bf16.msra.mxu3 %v530_v18  ;;  %v132_v49 = vpack.c.bf16 %v128_v48, %v127_v47  ;;  %574 = vset.pattern.permute.xlu2 %v667_v12  ;;  %v520_v25 = vsel %vm270_vm13, 1.0, %v664_v19  ;;  %v267_v35 = vadd.s32 24, %v264_v2  ;;  %vm46_vm2 = vcmask 8192  }
  0x22   :  { %573 = vset.pattern.permute.xlu0 %v668_v20  ;;  %575 = vset.pattern.permute.xlu1 %v668_v20  ;;  %vm271_vm15 = vcmp.lt.s32.totalorder %v269_v6, %v265_v29  ;;  %vm272_vm0 = vcmp.lt.s32.totalorder %v269_v6, %v266_v33  ;;  %47 = vst.msk [vmem:[#allocation2] sm:$0x1] %vm46_vm2, %v664_v19  ;;  %vm407_vm11 = vcmp.eq.s32.totalorder %v695_v3, 0 }
  0x23   :  { %v521_v30 = vsel %vm271_vm15, 1.0, %v664_v19  ;;  %v522_v34 = vsel %vm272_vm0, 1.0, %v664_v19  ;;  %vm273_vm1 = vcmp.lt.s32.totalorder %v269_v6, %v267_v35  ;;  %vm409_vm0 = vcmp.eq.s32.totalorder %v699_v5, 0 }
  0x24   :  { %203 = vmatpush.bf16.msra.mxu0 %v529_v24  ;;  %548 = vmatpush.bf16.msra.mxu2 %v529_v24  ;;  %v523_v36 = vsel %vm273_vm1, 1.0, %v664_v19 }
  0x25   :  { %549 = vmatpush.bf16.msra.mxu3 %v529_v24 }
  0x28   :  { %204 = vmatpush.bf16.msra.mxu0 %v528_v37  ;;  %550 = vmatpush.bf16.msra.mxu2 %v528_v37 }
  0x29   :  { %551 = vmatpush.bf16.msra.mxu3 %v528_v37  ;;  %v581_v19 = vld [vmem:[#allocation2] ss:$0 sm:$0xff] }
  0x2b   :  { %205 = vmatmul.bf16.vlgmr.msra.gmra.mxu0 %v129_v40  ;;  %210 = vmatmul.bf16.vlgmr.msra.gmra.mxu2 %v130_v41 }
  0x2c   :  { %215 = vmatmul.bf16.vlgmr.msra.gmra.mxu3 %v131_v42  ;;  %v324_v42 = vld [vmem:[#allocation2] sm:$0x1] }
  0x3c   :  { %220 = vmatmul.bf16.gmra.mxu3 %v132_v49 }
  0xa8   :  { %v799_v50 = vpop.f32.mrf.mxu0 }
  0xa9   :  { %230 = vrot.lane.b32.xlu2 %v799_v50, %s665_s0 }
  0xae   :  { %v802_v51 = vpop.f32.mrf.mxu2 }
  0xaf   :  { %v804_v52 = vpop.f32.mrf.mxu3 }
  0xb0   :  { %v806_v53 = vpop.f32.mrf.mxu0 }
  0xb1   :  { %246 = vrot.lane.b32.xlu2 %v804_v52, %s666_s1  ;;  %v563_v54 = vpack.i.bf16 %v806_v53, %v802_v51 }
  0xb3   :  { %564 = vrot.lane.b32.xlu1 %v563_v54, %s665_s0 }
  0xb6   :  { %v811_v55 = vpop.f32.mrf.mxu2 }
  0xb7   :  { %v813_v56 = vpop.f32.mrf.mxu3  ;;  %236 = vrot.lane.b32.xlu0 %v811_v55, %s665_s0 }
  0xbf   :  { %v816_v57 = vpop.f32.mrf.mxu3 }
  0xc0   :  { %v568_v58 = vpack.i.bf16 %v813_v56, %v816_v57 }
  0xc2   :  { %569 = vrot.lane.b32.xlu1 %v568_v58, %s666_s1 }
  0xc7   :  { %v820_v59 = vpop.f32.mrf.mxu3 }
  0xc8   :  { %252 = vrot.lane.b32.xlu0 %v820_v59, %s666_s1 }
 0x103   :  { %v231_v62 = vpop.permute.xlu2 %230 }
 0x10b   :  { %v247_v21 = vpop.permute.xlu2 %246 }
 0x10c   :  { %v259_v26 = vsel %vm258_vm12, %v231_v62, %v247_v21 }
 0x125   :  { %v565_v60 = vpop.permute.xlu1 %564 }
 0x126   :  { %v566_v8 = vunpack.i.l.bf16 %v565_v60  ;;  %v567_v13 = vunpack.i.h.bf16 %v565_v60 }
 0x129   :  { %v237_v61 = vpop.permute.xlu0 %236 }
 0x134   :  { %v570_v0 = vpop.permute.xlu1 %569 }
 0x135   :  { %v571_v1 = vunpack.i.l.bf16 %v570_v0  ;;  %v572_v10 = vunpack.i.h.bf16 %v570_v0 }
 0x137   :  { %v261_v18 = vsel %vm258_vm12, %v566_v8, %v571_v1  ;;  %v260_v24 = vsel %vm258_vm12, %v567_v13, %v572_v10 }
 0x13a   :  { %v253_v9 = vpop.permute.xlu0 %252 }
 0x13b   :  { %v262_v11 = vsel %vm258_vm12, %v237_v61, %v253_v9 }
 0x13c   :  { %307 = vmatpush.msra.mxu1 %v262_v11 }
 0x13e   :  { %308 = vmatpush.msra.mxu1 %v261_v18 }
 0x140   :  { %309 = vmatpush.msra.mxu1 %v260_v24 }
 0x142   :  { %310 = vmatpush.msra.mxu1 %v259_v26 }
 0x143   :  { %524 = vmatmul.msk.f32.vlgmr.msra.gmra.mxu1 %vm282_vm14, %v520_v25 }
 0x14b   :  { %525 = vmatmul.msk.f32.gmra.mxu1 %vm282_vm14, %v521_v30 }
 0x153   :  { %526 = vmatmul.msk.f32.gmra.mxu1 %vm282_vm14, %v522_v34 }
 0x15b   :  { %527 = vmatmul.msk.f32.gmra.mxu1 %vm282_vm14, %v523_v36  ;;  %vm408_vm14 = vcmp.eq.s32.totalorder %v697_v4, 0 }
 0x1c0   :  { %v312_v37 = vpop.f32.mrf.mxu1 }
 0x1c1   :  { %364 = vperm.xlu2 %574, %v312_v37   ;;  %327 = vperm.xlu0 %573, %v312_v37  }
 0x1c8   :  { %v315_v38 = vpop.f32.mrf.mxu1 }
 0x1c9   :  { %577 = vset.pattern.permute.xlu0 %v667_v12  ;;  %332 = vperm.xlu1 %575, %v315_v38  }
 0x1ca   :  { %368 = vperm.xlu0 %577, %v315_v38   ;;  %576 = vset.pattern.permute.xlu2 %v668_v20 }
 0x1d0   :  { %v318_v39 = vpop.f32.mrf.mxu1 }
 0x1d1   :  { %578 = vset.pattern.permute.xlu1 %v667_v12  ;;  %337 = vperm.xlu2 %576, %v318_v39  }
 0x1d2   :  { %372 = vperm.xlu1 %578, %v318_v39  }
 0x1d8   :  { %v321_v40 = vpop.f32.mrf.mxu1 }
 0x1d9   :  { %439 = vst [vmem:[#allocation1] sm:$0xff] %v321_v40  ;;  %580 = vset.pattern.permute.xlu2 %v667_v12 }
 0x1da   :  { %579 = vset.pattern.permute.xlu1 %v668_v20  ;;  %376 = vperm.xlu2 %580, %v321_v40  }
 0x1db   :  { %342 = vperm.xlu1 %579, %v321_v40  }
 0x1e0   :  { %v441_v41 = vld [vmem:[#allocation1 + $0x7] ss:$9 sm:$0xff] }
 0x1e1   :  { %445 = vst [vmem:[#allocation1] sm:$0xff] %v262_v11  ;;  %v443_v43 = vadd.f32 %v441_v41, %v324_v42 }
 0x1e2   :  { %384 = vperm.xlu2 %580, %v581_v19  }
 0x1e3   :  { %352 = vperm.xlu1 %579, %v581_v19  }
 0x1e8   :  { %v447_v44 = vld [vmem:[#allocation1 + $0x7] ss:$9 sm:$0xff] }
 0x1e9   :  { %v449_v47 = vadd.f32 %v447_v44, %v443_v43 }
 0x1eb   :  { %451 = vst.msk [vmem:[#allocation2] sm:$0x1] %vm46_vm2, %v449_v47  ;;  %vm410_vm2 = vcmp.eq.s32.totalorder %v701_v7, 0 }
 0x21b   :  { %v365_v48 = vpop.permute.xlu2 %364 }
 0x21c   :  { %v379_v1 = vadd.f32 %v365_v48, %v804_v52 }
 0x22b   :  { %v338_v49 = vpop.permute.xlu2 %337 }
 0x22c   :  { %v347_v12 = vadd.f32 %v338_v49, %v802_v51 }
 0x233   :  { %v328_v58 = vpop.permute.xlu0 %327 }
 0x234   :  { %v377_v60 = vpop.permute.xlu2 %376  ;;  %v345_v13 = vadd.f32 %v328_v58, %v799_v50 }
 0x235   :  { %v382_v9 = vadd.f32 %v377_v60, %v820_v59 }
 0x23b   :  { %v333_v54 = vpop.permute.xlu1 %332 }
 0x23c   :  { %v369_v62 = vpop.permute.xlu0 %368  ;;  %v385_v0 = vpop.permute.xlu2 %384  ;;  %v346_v18 = vadd.f32 %v333_v54, %v806_v53 }
 0x23d   :  { %v380_v2 = vadd.f32 %v369_v62, %v813_v56  ;;  %v387_v8 = vadd.f32 %v385_v0, %v379_v1  ;;  %v390_v24 = vadd.f32 %v385_v0, %v382_v9 }
 0x23f   :  { %v388_v10 = vadd.f32 %v385_v0, %v380_v2  ;;  %v391_v52 = vadd.f32 %v772_v31, %v387_v8  ;;  %v394_v33 = vadd.f32 %v795_v46, %v390_v24 }
 0x241   :  { %v392_v59 = vadd.f32 %v777_v32, %v388_v10  ;;  %vm399_vm3 = vcmp.gt.f32.partialorder %v391_v52, 0.5  ;;  %vm402_vm13 = vcmp.gt.f32.partialorder %v394_v33, 0.5 }
 0x243   :  { %vm400_vm7 = vcmp.gt.f32.partialorder %v392_v59, 0.5 }
 0x244   :  { %v373_v61 = vpop.permute.xlu1 %372 }
 0x245   :  { %v381_v6 = vadd.f32 %v373_v61, %v816_v57 }
 0x247   :  { %v389_v11 = vadd.f32 %v385_v0, %v381_v6 }
 0x249   :  { %v393_v30 = vadd.f32 %v792_v45, %v389_v11 }
 0x24b   :  { %vm401_vm10 = vcmp.gt.f32.partialorder %v393_v30, 0.5 }
 0x24d   :  { %v343_v63 = vpop.permute.xlu1 %342 }
 0x24e   :  { %v348_v21 = vadd.f32 %v343_v63, %v811_v55 }
 0x255   :  { %v353_v25 = vpop.permute.xlu1 %352 }
 0x256   :  { %v355_v56 = vadd.f32 %v353_v25, %v345_v13  ;;  %v356_v26 = vadd.f32 %v353_v25, %v346_v18  ;;  %v357_v57 = vadd.f32 %v353_v25, %v347_v12  ;;  %v358_v29 = vadd.f32 %v353_v25, %v348_v21 }
 0x258   :  { %v359_v51 = vadd.f32 %v742_v22, %v355_v56  ;;  %v360_v50 = vadd.f32 %v745_v23, %v356_v26  ;;  %v361_v53 = vadd.f32 %v756_v27, %v357_v57  ;;  %v362_v55 = vadd.f32 %v761_v28, %v358_v29 }
 0x25a   :  { %vm395_vm4 = vcmp.gt.f32.partialorder %v359_v51, 0.5  ;;  %vm396_vm5 = vcmp.gt.f32.partialorder %v360_v50, 0.5  ;;  %vm397_vm6 = vcmp.gt.f32.partialorder %v361_v53, 0.5  ;;  %vm398_vm8 = vcmp.gt.f32.partialorder %v362_v55, 0.5 }
 0x25b   :  { %vm403_vm9 = vmor %vm395_vm4, %vm399_vm3 }
 0x25c   :  { %vm404_vm12 = vmor %vm396_vm5, %vm400_vm7 }
 0x25d   :  { %vm405_vm15 = vmor %vm397_vm6, %vm401_vm10  ;;  %vm669_vm6 = vmmov 1  }
 0x25e   :  { %vm406_vm1 = vmor %vm398_vm8, %vm402_vm13 }
 0x25f   :  { %vm411_vm3 = vmor %vm403_vm9, %vm407_vm11 }
 0x260   :  { %vm412_vm4 = vmor %vm404_vm12, %vm408_vm14 }
 0x261   :  { %vm413_vm5 = vmor %vm405_vm15, %vm409_vm0 }
 0x262   :  { %vm414_vm7 = vmor %vm406_vm1, %vm410_vm2 }
 0x263   :  { %vm415_vm10 = vmxor %vm411_vm3, %vm669_vm6 }
 0x264   :  { %vm416_vm8 = vmxor %vm412_vm4, %vm669_vm6  ;;  %v419_v22 = vsel %vm415_vm10, 1, %v668_v20 }
 0x265   :  { %vm417_vm13 = vmxor %vm413_vm5, %vm669_vm6  ;;  %v420_v3 = vsel %vm416_vm8, 1, %v668_v20  ;;  %v423_v23 = vshll.u32 %v419_v22, 8 }
 0x266   :  { %vm418_vm9 = vmxor %vm414_vm7, %vm669_vm6  ;;  %v421_v4 = vsel %vm417_vm13, 1, %v668_v20  ;;  %v424_v5 = vshll.u32 %v420_v3, 8 }
 0x267   :  { %v422_v27 = vsel %vm418_vm9, 1, %v668_v20  ;;  %v425_v7 = vshll.u32 %v421_v4, 8  ;;  %v427_v28 = vor.u32 %v423_v23, %v716_v14 }
 0x268   :  { %v426_v31 = vshll.u32 %v422_v27, 8  ;;  %v428_v32 = vor.u32 %v424_v5, %v719_v15 }
 0x269   :  { %v429_v45 = vor.u32 %v425_v7, %v722_v16  ;;  %v431_v46 = vpack.c.b16 %v427_v28, %v427_v28 }
 0x26a   :  { %v430_v34 = vor.u32 %v426_v31, %v725_v17  ;;  %v432_v35 = vpack.c.b16 %v428_v32, %v428_v32 }
 0x26b   :  { %v433_v36 = vpack.c.b16 %v429_v45, %v429_v45  ;;  %435 = vst [vmem:[#allocation8] sm:$0xf] %v431_v46 }
 0x26c   :  { %v434_v20 = vpack.c.b16 %v430_v34, %v430_v34  ;;  %436 = vst [vmem:[#allocation8 + $0x4] sm:$0xf] %v432_v35 }
 0x26d   :  { %437 = vst [vmem:[#allocation8 + $0x8] sm:$0xf] %v433_v36 }
 0x26e   :  { %438 = vst [vmem:[#allocation8 + $0xc] sm:$0xf] %v434_v20 }
 0x26f   :  { %464 = dma.vmem_to_hbm [thread:$0]  %s457_s22, 256, %s459_s25, [#allocation5], %s662_s19, %s662_s19, %s663_s20  }
 0x270   :  { %658 = dma.done.wait [#allocation5], 256  }
 0x271   :  { %659 = vsyncadd [#allocation5], 4294967040 }
 0x272   :  { %469 = vsyncpa [#allocation4], 1 }
 0x273   :  { %470 = vsyncpa [#allocation7], 1 }
 0x274   :  { %471 = vsyncpa [#allocation5], 1 }

</bundles_post_ra>
